<compile_context>
chip_gen: v6e
topology: v6e:2x2x1
jax: 0.10.0
libtpu: 0.0.40
codegen_flags: <defaults>
</compile_context>

<pallas_src>
import jax
import jax.numpy as jnp
from jax.experimental import pallas as pl
from jax.experimental.pallas import tpu as pltpu


def ffn_kernel(x_ref, w1_ref, b1_ref, w2_ref, b2_ref, o_ref, acc_ref):
    # x_ref:  (tm, d_model)      w1_ref: (d_model, tk_ff)   b1_ref: (1, tk_ff)
    # w2_ref: (tk_ff, d_model)   b2_ref: (1, d_model)
    # o_ref:  (tm, d_model)      acc_ref: (tm, d_model) f32 scratch
    j = pl.program_id(1)

    @pl.when(j == 0)
    def _():
        acc_ref[...] = jnp.zeros_like(acc_ref)

    x = x_ref[...]
    # fc1 chunk on the MXU, f32 accumulation.
    h = jnp.dot(x, w1_ref[...], preferred_element_type=jnp.float32)
    h = h + b1_ref[...].astype(jnp.float32)
    h = jnp.maximum(h, 0.0)                       # ReLU on the VPU (f32)
    h = h.astype(w2_ref.dtype)                    # back to operand dtype for MXU
    # Partial fc2 product for this d_ff slab, accumulated in f32.
    acc_ref[...] += jnp.dot(h, w2_ref[...], preferred_element_type=jnp.float32)

    @pl.when(j == pl.num_programs(1) - 1)
    def _():
        out = acc_ref[...] + b2_ref[...].astype(jnp.float32)   # b2 added once
        o_ref[...] = out.astype(o_ref.dtype)


def _round_up(a, b):
    return (a + b - 1) // b * b


def position_wise_feed_forward(x, w1, b1, w2, b2, *, tm=256, tk_ff=256):
    """x: (batch, seq, d_model) -> (batch, seq, d_model).  Eval-mode FFN."""
    batch, seq, d_model = x.shape
    d_ff = w1.shape[1]
    M = batch * seq

    # ---- effective tiles -----------------------------------------------
    # Row tile: big by default (>=128 recommended), clamped for tiny inputs.
    tm_eff = min(tm, _round_up(M, 8))
    M_pad = _round_up(M, tm_eff)

    # d_ff slab: must divide d_ff and be lane-aligned (multiple of 128) unless
    # it is the full d_ff.
    tk_eff = min(tk_ff, d_ff)
    if (d_ff % tk_eff != 0) or (tk_eff != d_ff and tk_eff % 128 != 0):
        tk_eff = d_ff  # fall back to un-tiled d_ff

    # NOTE: d_model (the output lane dim) should be a multiple of 128 for
    # unmasked vector stores on real model sizes; it is always legal here
    # because the block covers the full last dim.

    # ---- flatten / pad ----------------------------------------------------
    x2d = x.reshape(M, d_model)
    if M_pad != M:
        x2d = jnp.pad(x2d, ((0, M_pad - M), (0, 0)))
    b1_2d = b1.reshape(1, d_ff)
    b2_2d = b2.reshape(1, d_model)

    grid = (M_pad // tm_eff, d_ff // tk_eff)

    itemsize = x.dtype.itemsize
    w_itemsize = w1.dtype.itemsize
    cost = pl.CostEstimate(
        flops=4 * M_pad * d_model * d_ff,          # two matmuls, 2*M*K*N each
        transcendentals=0,
        bytes_accessed=(2 * M_pad * d_model * itemsize        # x + out
                        + 2 * d_model * d_ff * w_itemsize      # W1 + W2
                        + (d_ff + d_model) * w_itemsize),      # biases
    )

    out2d = pl.pallas_call(
        ffn_kernel,
        out_shape=jax.ShapeDtypeStruct((M_pad, d_model), x.dtype),
        grid_spec=pltpu.PrefetchScalarGridSpec(
            num_scalar_prefetch=0,
            grid=grid,
            in_specs=[
                pl.BlockSpec((tm_eff, d_model), lambda i, j: (i, 0)),   # x tile
                pl.BlockSpec((d_model, tk_eff), lambda i, j: (0, j)),   # W1 slab
                pl.BlockSpec((1, tk_eff), lambda i, j: (0, j)),         # b1 slab
                pl.BlockSpec((tk_eff, d_model), lambda i, j: (j, 0)),   # W2 slab
                pl.BlockSpec((1, d_model), lambda i, j: (0, 0)),        # b2
            ],
            out_specs=pl.BlockSpec((tm_eff, d_model), lambda i, j: (i, 0)),
            scratch_shapes=[pltpu.VMEM((tm_eff, d_model), jnp.float32)],
        ),
        compiler_params=pltpu.CompilerParams(
            dimension_semantics=("parallel", "arbitrary"),
            vmem_limit_bytes=48 * 1024 * 1024,
        ),
        cost_estimate=cost,
    )(x2d, w1, b1_2d, w2, b2_2d)

    return out2d[:M].reshape(batch, seq, d_model)


def init_linear_params(key, in_features, out_features, dtype=jnp.float32):
    """Deterministic init mirroring nn.Linear's U(-1/sqrt(in), 1/sqrt(in))."""
    kw, kb = jax.random.split(key)
    bound = 1.0 / (in_features ** 0.5)
    # Stored as (in, out) so the kernel does x @ W (== x @ torch_weight.T).
    w = jax.random.uniform(kw, (in_features, out_features), dtype,
                           minval=-bound, maxval=bound)
    b = jax.random.uniform(kb, (out_features,), dtype,
                           minval=-bound, maxval=bound)
    return w, b


if __name__ == "__main__":
    d_model, d_ff = 128, 256          # lane-aligned small shapes
    batch, seq = 2, 8

    key = jax.random.PRNGKey(0)
    kx, k1, k2 = jax.random.split(key, 3)

    x = jax.random.normal(kx, (batch, seq, d_model), dtype=jnp.float32)
    w1, b1 = init_linear_params(k1, d_model, d_ff)
    w2, b2 = init_linear_params(k2, d_ff, d_model)

    hp = jax.lax.Precision.HIGHEST

    # ---- f32 path (exercises the d_ff reduction axis: grid = (1, 2)) -------
    out = position_wise_feed_forward(x, w1, b1, w2, b2, tm=256, tk_ff=128)
    out = jax.block_until_ready(out)

    x2 = x.reshape(-1, d_model)
    h_ref = jnp.maximum(jnp.matmul(x2, w1, precision=hp) + b1, 0.0)
    ref = (jnp.matmul(h_ref, w2, precision=hp) + b2).reshape(batch, seq, d_model)
    assert out.shape == (batch, seq, d_model)
    assert jnp.allclose(out, ref, atol=1e-4, rtol=1e-4)

    # ---- bf16 weights/activations (v6e/v7x recommendation), f32 accum ------
    xb, w1b, b1b = (t.astype(jnp.bfloat16) for t in (x, w1, b1))
    w2b, b2b = (t.astype(jnp.bfloat16) for t in (w2, b2))
    out_b = position_wise_feed_forward(xb, w1b, b1b, w2b, b2b, tm=256, tk_ff=128)
    out_b = jax.block_until_ready(out_b)

    # Reference emulating the kernel's bf16 operand / f32 accumulate path.
    x32, w132, b132 = (t.astype(jnp.float32) for t in (xb, w1b, b1b))
    w232, b232 = (t.astype(jnp.float32) for t in (w2b, b2b))
    h_b = jnp.maximum(jnp.matmul(x32.reshape(-1, d_model), w132, precision=hp) + b132, 0.0)
    h_b = h_b.astype(jnp.bfloat16).astype(jnp.float32)     # kernel casts h to bf16
    ref_b = (jnp.matmul(h_b, w232, precision=hp) + b232).reshape(batch, seq, d_model)
    assert jnp.allclose(out_b.astype(jnp.float32), ref_b, atol=5e-2, rtol=5e-2)

    print("KERNEL_OK")
</pallas_src>

<mosaic_0001>
module attributes {stable_mosaic.version = 11 : i64} {
  func.func @ffn_kernel(%arg0: i32, %arg1: i32, %arg2: memref<16x128xf32, #tpu.memory_space<vmem>>, %arg3: memref<128x128xf32, #tpu.memory_space<vmem>>, %arg4: memref<1x128xf32, #tpu.memory_space<vmem>>, %arg5: memref<128x128xf32, #tpu.memory_space<vmem>>, %arg6: memref<1x128xf32, #tpu.memory_space<vmem>>, %arg7: memref<16x128xf32, #tpu.memory_space<vmem>>, %arg8: memref<16x128xf32, #tpu.memory_space<vmem>>) attributes {dimension_semantics = [#tpu.dimension_semantics<parallel>, #tpu.dimension_semantics<arbitrary>], iteration_bounds = array<i64: 1, 2>, scalar_prefetch = 0 : i64, scratch_operands = 1 : i64, tpu.core_type = #tpu.core_type<tc>, window_params = [{transform_indices = @transform_0, window_bounds = array<i64: 16, 128>}, {transform_indices = @transform_1, window_bounds = array<i64: 128, 128>}, {transform_indices = @transform_2, window_bounds = array<i64: 1, 128>}, {transform_indices = @transform_3, window_bounds = array<i64: 128, 128>}, {pipeline_mode = #tpu.pipeline_mode<synchronous>, transform_indices = @transform_4, window_bounds = array<i64: 1, 128>}, {transform_indices = @transform_5, window_bounds = array<i64: 16, 128>}]} {
    %c0_i32 = arith.constant 0 : i32
    %0 = arith.cmpi eq, %arg1, %c0_i32 : i32
    %1 = arith.extui %0 : i1 to i32
    %c0_i32_0 = arith.constant 0 : i32
    %2 = arith.cmpi ne, %1, %c0_i32_0 : i32
    scf.if %2 {
      %cst_15 = arith.constant 0.000000e+00 : f32
      %19 = vector.broadcast %cst_15 : f32 to vector<16x128xf32>
      %c0_16 = arith.constant 0 : index
      %c0_17 = arith.constant 0 : index
      %20 = vector.load %arg8[%c0_16, %c0_17] : memref<16x128xf32, #tpu.memory_space<vmem>>, vector<16x128xf32>
      tpu.vector_store %arg8[%c0_16, %c0_17], %19 {strides = array<i32>} : memref<16x128xf32, #tpu.memory_space<vmem>>, vector<16x128xf32>,
    } else {
    }
    %c0 = arith.constant 0 : index
    %c0_1 = arith.constant 0 : index
    %3 = vector.load %arg2[%c0, %c0_1] : memref<16x128xf32, #tpu.memory_space<vmem>>, vector<16x128xf32>
    %c0_2 = arith.constant 0 : index
    %c0_3 = arith.constant 0 : index
    %4 = vector.load %arg3[%c0_2, %c0_3] : memref<128x128xf32, #tpu.memory_space<vmem>>, vector<128x128xf32>
    %cst = arith.constant dense<0.000000e+00> : vector<16x128xf32>
    %5 = tpu.matmul %3, %4, %cst {dimension_numbers = #tpu.dot_dimension_numbers<[1], [0], [0], [1], [0, 0, 1, 1], [], []>} : vector<16x128xf32>, vector<128x128xf32>, vector<16x128xf32> -> vector<16x128xf32>
    %c0_4 = arith.constant 0 : index
    %c0_5 = arith.constant 0 : index
    %6 = vector.load %arg4[%c0_4, %c0_5] : memref<1x128xf32, #tpu.memory_space<vmem>>, vector<1x128xf32>
    %7 = vector.broadcast %6 : vector<1x128xf32> to vector<16x128xf32>
    %8 = arith.addf %5, %7 : vector<16x128xf32>
    %cst_6 = arith.constant 0.000000e+00 : f32
    %9 = vector.broadcast %cst_6 : f32 to vector<16x128xf32>
    %10 = arith.maximumf %8, %9 : vector<16x128xf32>
    %c0_7 = arith.constant 0 : index
    %c0_8 = arith.constant 0 : index
    %11 = vector.load %arg8[%c0_7, %c0_8] : memref<16x128xf32, #tpu.memory_space<vmem>>, vector<16x128xf32>
    %c0_9 = arith.constant 0 : index
    %c0_10 = arith.constant 0 : index
    %12 = vector.load %arg5[%c0_9, %c0_10] : memref<128x128xf32, #tpu.memory_space<vmem>>, vector<128x128xf32>
    %cst_11 = arith.constant dense<0.000000e+00> : vector<16x128xf32>
    %13 = tpu.matmul %10, %12, %cst_11 {dimension_numbers = #tpu.dot_dimension_numbers<[1], [0], [0], [1], [0, 0, 1, 1], [], []>} : vector<16x128xf32>, vector<128x128xf32>, vector<16x128xf32> -> vector<16x128xf32>
    %14 = arith.addf %11, %13 : vector<16x128xf32>
    %c0_12 = arith.constant 0 : index
    %c0_13 = arith.constant 0 : index
    %15 = vector.load %arg8[%c0_12, %c0_13] : memref<16x128xf32, #tpu.memory_space<vmem>>, vector<16x128xf32>
    tpu.vector_store %arg8[%c0_12, %c0_13], %14 {strides = array<i32>} : memref<16x128xf32, #tpu.memory_space<vmem>>, vector<16x128xf32>,
    %c1_i32 = arith.constant 1 : i32
    %16 = arith.cmpi eq, %arg1, %c1_i32 : i32
    %17 = arith.extui %16 : i1 to i32
    %c0_i32_14 = arith.constant 0 : i32
    %18 = arith.cmpi ne, %17, %c0_i32_14 : i32
    scf.if %18 {
      %c0_15 = arith.constant 0 : index
      %c0_16 = arith.constant 0 : index
      %19 = vector.load %arg8[%c0_15, %c0_16] : memref<16x128xf32, #tpu.memory_space<vmem>>, vector<16x128xf32>
      %c0_17 = arith.constant 0 : index
      %c0_18 = arith.constant 0 : index
      %20 = vector.load %arg6[%c0_17, %c0_18] : memref<1x128xf32, #tpu.memory_space<vmem>>, vector<1x128xf32>
      %21 = vector.broadcast %20 : vector<1x128xf32> to vector<16x128xf32>
      %22 = arith.addf %19, %21 : vector<16x128xf32>
      %c0_19 = arith.constant 0 : index
      %c0_20 = arith.constant 0 : index
      %23 = vector.load %arg7[%c0_19, %c0_20] : memref<16x128xf32, #tpu.memory_space<vmem>>, vector<16x128xf32>
      tpu.vector_store %arg7[%c0_19, %c0_20], %22 {strides = array<i32>} : memref<16x128xf32, #tpu.memory_space<vmem>>, vector<16x128xf32>,
    } else {
    }
    return
  }
  func.func @transform_0(%arg0: i32, %arg1: i32) -> (i32, i32) {
    %c0_i32 = arith.constant 0 : i32
    %c0_i32_0 = arith.constant 0 : i32
    return %arg0, %c0_i32 : i32, i32
  }
  func.func @transform_1(%arg0: i32, %arg1: i32) -> (i32, i32) {
    %c0_i32 = arith.constant 0 : i32
    %c0_i32_0 = arith.constant 0 : i32
    return %c0_i32, %arg1 : i32, i32
  }
  func.func @transform_2(%arg0: i32, %arg1: i32) -> (i32, i32) {
    %c0_i32 = arith.constant 0 : i32
    %c0_i32_0 = arith.constant 0 : i32
    return %c0_i32, %arg1 : i32, i32
  }
  func.func @transform_3(%arg0: i32, %arg1: i32) -> (i32, i32) {
    %c0_i32 = arith.constant 0 : i32
    %c0_i32_0 = arith.constant 0 : i32
    return %arg1, %c0_i32 : i32, i32
  }
  func.func @transform_4(%arg0: i32, %arg1: i32) -> (i32, i32) {
    %c0_i32 = arith.constant 0 : i32
    %c0_i32_0 = arith.constant 0 : i32
    %c0_i32_1 = arith.constant 0 : i32
    return %c0_i32, %c0_i32_0 : i32, i32
  }
  func.func @transform_5(%arg0: i32, %arg1: i32) -> (i32, i32) {
    %c0_i32 = arith.constant 0 : i32
    %c0_i32_0 = arith.constant 0 : i32
    return %arg0, %c0_i32 : i32, i32
  }
}

</mosaic_0001>

<bundles_post_ra>
// kernel: tpu_custom_call.1
= control target key start
LH: loop header
LB: loop body
LE: loop exit
PB: predicated region body
PF: predicated region fallthrough
CT: control target
= control target key end

     0   :  { %10 = vsyncpa [#allocation4], 0  ;;  %s1307_s0 = inlined_call_operand.hbm [shape: f32[16,128], index: 0, kind: input, shape index: {}]   ;;  %s1308_s1 = inlined_call_operand.hbm [shape: f32[128,256], index: 1, kind: input, shape index: {}]   ;;  %s1309_s2 = inlined_call_operand.vmem [shape: f32[1,256], index: 2, kind: input, shape index: {}]   ;;  %s1310_s3 = inlined_call_operand.hbm [shape: f32[256,128], index: 3, kind: input, shape index: {}]   ;;  %s1311_s4 = inlined_call_operand.vmem [shape: f32[1,128], index: 4, kind: input, shape index: {}]   ;;  %s1312_s5 = inlined_call_operand.hbm [shape: f32[16,128], index: 5, kind: output, shape index: {}]  }
   0x1   :  { %11 = vsyncpa [#allocation7], 0 }
   0x2   :  { %13 = vsyncpa [#allocation7 + $0x1], 0 }
   0x3   :  { %14 = vsyncpa [#allocation5], 0  ;;  %s1080_s18 = smov 0   ;;  %s1082_s19 = smov 0  }
   0x4   :  { %s1084_s20 = smov 0   ;;  %s1086_s21 = smov 0  }
   0x5   :  { %s1088_s22 = smov 0   ;;  %s1090_s23 = smov 0  }
   0x6 LB: > { %s29_s24 = sadd.s32 1, %s1034_s22  ;;  %s65_s25 = sadd.s32 1, %s1026_s20  ;;  %s1038_s23 = sphi %s1090_s23, %s20_s23   ;;  %s1034_s22 = sphi %s1088_s22, %s1328_s22   ;;  %s1030_s21 = sphi %s1086_s21, %s1327_s21   ;;  %s1026_s20 = sphi %s1084_s20, %s1326_s20   ;;  %s1022_s19 = sphi %s1082_s19, %s1325_s19   ;;  %s1018_s18 = sphi %s1080_s18, %s1324_s18  }
   0x7   : > { %p30_p0 = scmp.ge.s32.totalorder %s29_s24, 2  ;;  %p72_p1 = scmp.ne.s32.totalorder %s1026_s20, %s1022_s19 }
   0x8   : > { %p73_p2 = scmp.eq.s32.totalorder %s1038_s23, 0  ;;  %p814_p5 = scmp.lt.s32.totalorder %s1038_s23, 2 }
   0x9   : > { %s1330_s24 = smov (%p30_p0, %s29_s24), 0  ;;  %s220_s28 = sand.u32 1, %s1038_s23  }
   0xa   : > { %p1117_p3 = por %p73_p2, %p72_p1  ;;  %s62_s27 = ssub.s32 %s1034_s22, %s1330_s24 }
   0xb   : > { %p63_p4 = scmp.eq.s32.totalorder %s62_s27, 0  ;;  %s222_s29 = sand.u32 1, %s1026_s20  }
   0xc   : > { %s1129_s6 = sshll.u32 %s222_s29, 7  ;;  %s667_s7 = sshll.u32 %s1034_s22, 7 }
   0xd   : > { %s1127_s30 = scalar_select %p63_p4, %s1026_s20, %s65_s25  }
   0xe   : > { %s229_s10 = scalar_lea.hbm %s1308_s1, %s667_s7  ;;  %s224_s11 = scalar_lea.vmem [#allocation6], %s1129_s6 }
   0xf   : > { %s230_s12 = sshll.u32 %s224_s11, 4  ;;  %p1138_p6 = pnand %p814_p5, %p1117_p3  ;;  %s231_s12 = int_to_ptr.vmem [resolvable:$true] %s230_s12 }
  0x10   : > { %s1142_s14 = scalar_lea.sflag [#allocation7], %s220_s28  ;;  %s887_s15 = scalar_lea.vmem %s231_s12, 2048 }
  0x11   : > { %p876_p7 = pneg %p1138_p6  ;;  %p888_p8 = scmp.ne.s32.totalorder %s231_s12, %s887_s15 }
  0x12   : > { %s1040_s16 = smov [#allocation6]  }
  0x13   : > { %p890_p9 = pnand %p888_p8, %p876_p7  ;;  %s892_s17 = sshll.u32 %s1040_s16, 4  ;;  %s893_s17 = int_to_ptr.vmem [resolvable:$false] %s892_s17 }
  0x14   : > { %s894_s25 = scalar_lea.vmem %s893_s17, 4096  ;;  %p895_p11 = scmp.lt.s32.totalorder %s231_s12, %s893_s17 }
  0x15   : > { %p891_p10 = pneg %p890_p9  ;;  %p896_p12 = scmp.lt.s32.totalorder %s894_s25, %s887_s15 }
  0x17   : > { %p897_p13 = por %p896_p12, %p895_p11 }
  0x19   : > { %p898_p0 = pnand %p897_p13, %p891_p10 }
  0x1b   : > { %901 = shalt.err (!%p898_p0)
}
  0x1c   : > { %s1041_s26 = smov 256   ;;  %s1313_s27 = smov 128  }
  0x1d   : > { %s1315_s28 = smov 8   ;;  %s1155_s29 = sadd.s32 4294967295, %s1038_s23  }
  0x1e   : > { %809 = dma.hbm_to_vmem [thread:$0]  (!%p1138_p6), %s229_s10, 2048, %s231_s12, %s1142_s14, %s1041_s26, %s1313_s27, %s1315_s28  }
  0x1f   : > { %p78_p1 = scmp.ne.s32.totalorder %s1022_s19, %s1018_s18  ;;  %p79_p2 = scmp.eq.s32.totalorder %s1155_s29, 0 }
  0x20   : > { %p663_p3 = scmp.ge.s32.totalorder %s1038_s23, 1  ;;  %p188_p4 = scmp.lt.s32.totalorder %s1038_s23, 3 }
  0x21   : > { %p1164_p5 = por %p79_p2, %p78_p1  ;;  %s1044_s9 = smov [#allocation3]  }
  0x22   : > { %p1168_p8 = pnand %p663_p3, %p188_p4  ;;  %s203_s10 = sshll.u32 %s1044_s9, 4  ;;  %s1172_s10 = int_to_ptr.vmem [resolvable:$true] %s203_s10 }
  0x23   : > { %s683_s18 = sshll.u32 %s1034_s22, 11  ;;  %s250_s16 = scalar_lea.vmem [#allocation8], %s1129_s6 }
  0x24   : > { %p802_p9 = pneg %p1168_p8  ;;  %s256_s15 = scalar_lea.hbm %s1310_s3, %s683_s18 }
  0x25   : > { %s257_s17 = sshll.u32 %s250_s16, 4  ;;  %s1045_s9 = smov [#allocation8]   ;;  %s258_s17 = int_to_ptr.vmem [resolvable:$true] %s257_s17 }
  0x26   : > { %p1183_p10 = pnand %p802_p9, %p79_p2  ;;  %s915_s26 = scalar_lea.vmem %s258_s17, 2048 }
  0x27   : > { %p916_p11 = scmp.ne.s32.totalorder %s258_s17, %s915_s26  ;;  %s920_s27 = sshll.u32 %s1045_s9, 4  ;;  %s921_s27 = int_to_ptr.vmem [resolvable:$false] %s920_s27 }
  0x28   : > { %s922_s28 = scalar_lea.vmem %s921_s27, 4096  ;;  %p923_p0 = scmp.lt.s32.totalorder %s258_s17, %s921_s27 }
  0x29   : > { %p918_p12 = pnand %p916_p11, %p876_p7  ;;  %p924_p1 = scmp.lt.s32.totalorder %s922_s28, %s915_s26 }
  0x2b   : > { %p919_p13 = pneg %p918_p12  ;;  %p925_p3 = por %p924_p1, %p923_p0 }
  0x2d   : > { %p926_p4 = pnand %p925_p3, %p919_p13 }
  0x2f   : > { %929 = shalt.err (!%p926_p4)
}
  0x30   : > { %s1322_s6 = smov 8   ;;  %s1323_s18 = smov 128  }
  0x31   : > { %812 = dma.hbm_to_vmem [thread:$0]  (!%p1138_p6), %s256_s15, 2048, %s258_s17, %s1142_s14, %s1323_s18, %s1323_s18, %s1322_s6  }
  0x32   : > { %p932_p7 = pneg %p1183_p10  ;;  %s941_s11 = scalar_lea.vmem %s1172_s10, 256 }
  0x33   : > { %p942_p9 = scmp.ne.s32.totalorder %s1172_s10, %s941_s11  ;;  %p949_p13 = scmp.lt.s32.totalorder %s1172_s10, %s1172_s10 }
  0x34   : > { %p950_p0 = scmp.lt.s32.totalorder %s941_s11, %s941_s11 }
  0x35   : > { %p944_p11 = pnand %p942_p9, %p932_p7 }
  0x36   : > { %p951_p1 = por %p950_p0, %p949_p13 }
  0x37   : > { %p945_p12 = pneg %p944_p11 }
  0x39   : > { %p952_p3 = pnand %p951_p1, %p945_p12 }
  0x3b   : > { %955 = shalt.err (!%p952_p3)
}
  0x3c   : > { %805 = dma.hbm_to_vmem [thread:$0]  (!%p1183_p10), %s1307_s0, 256, %s1172_s10, [#allocation4], %s1323_s18, %s1323_s18, %s1322_s6  }
  0x3d   : > { %269 = sbr.rel (%p1168_p8) target bundleno = 538 (0x21a), region = 40 }
  0x42   : > { %1005 = dma.done.wait (%p79_p2), [#allocation4], 256  }
  0x43   : > { %1007 = vsyncadd (%p79_p2), [#allocation4], 4294967040  ;;  %s275_s27 = sand.u32 1, %s1155_s29   ;;  %s277_s28 = sand.u32 1, %s1022_s19  }
  0x44   : > { %s673_s12 = sshll.u32 %s277_s28, 7  ;;  %s276_s15 = scalar_lea.sflag [#allocation7], %s275_s27 }
  0x45   : > { %s1219_s16 = scalar_lea.vmem [#allocation6], %s673_s12 }
  0x46   : > { %1009 = dma.done.wait (%p1164_p5), %s276_s15, 4096  }
  0x47   : > { %1011 = vsyncadd (%p1164_p5), %s276_s15, 4294963200  ;;  %p319_p6 = scmp.lt.s32.totalorder %s1030_s21, 1  ;;  %s1233_s26 = scalar_lea.vmem [#allocation8], %s673_s12 }
  0x48   : > { %p675_p2 = scmp.ne.s32.totalorder %s1030_s21, 0 }
  0x49   : > { %s1227_s8 = scalar_select %p319_p6, %s1030_s21, 1 }
  0x4a   : > { %327 = sbr.rel (%p675_p2) target bundleno = 81 (0x51), region = 56 }
  0x4b   : > { %s321_s25 = scalar_lea.vmem %s1309_s2, %s1227_s8 }
  0x4f   : > { %v1046_v0 = vmov 0.0  }
  0x50   : > { %328 = vst [vmem:[#allocation2] sm:$0xff] %v1046_v0  ;;  %329 = vst [vmem:[#allocation2 + $0x8] sm:$0xff] %v1046_v0 }
  0x51 PF: > { %v347_v1 = vld [vmem:[%s1219_s16 + $0x78] sm:$0xff]  ;;  %v346_v2 = vld [vmem:[%s1219_s16 + $0x70] sm:$0xff]  ;;  %v345_v3 = vld [vmem:[%s1219_s16 + $0x68] sm:$0xff]  ;;  %p677_p5 = scmp.ne.s32.totalorder %s1030_s21, 1 }
  0x52   : > { %720 = vmatprep.subr.mxu0 %v347_v1  ;;  %v344_v4 = vld [vmem:[%s1219_s16 + $0x60] sm:$0xff]  ;;  %v330_v5 = vld [vmem:[#allocation3] sm:$0xff]  ;;  %v343_v6 = vld [vmem:[%s1219_s16 + $0x58] sm:$0xff] }
  0x53   : > { %721 = vmatpush3.msra.mxu0 %v347_v1  ;;  %752 = vmatprep.mubr.f32.mxu0 %v330_v5  ;;  %v449_v7 = vld [vmem:[%s1233_s26 + $0x78] sm:$0xff]  ;;  %v448_v8 = vld [vmem:[%s1233_s26 + $0x70] sm:$0xff]  ;;  %v447_v10 = vld [vmem:[%s1233_s26 + $0x68] sm:$0xff] }
  0x54   : > { %722 = vmatprep.subr.mxu0 %v346_v2  ;;  %755 = vmatprep.subr.mxu1 %v449_v7  ;;  %v342_v9 = vld [vmem:[%s1219_s16 + $0x50] sm:$0xff]  ;;  %v341_v11 = vld [vmem:[%s1219_s16 + $0x48] sm:$0xff]  ;;  %v446_v12 = vld [vmem:[%s1233_s26 + $0x60] sm:$0xff] }
  0x55   : > { %723 = vmatpush3.msra.mxu0 %v346_v2  ;;  %756 = vmatpush3.msra.mxu1 %v449_v7  ;;  %v340_v13 = vld [vmem:[%s1219_s16 + $0x40] sm:$0xff]  ;;  %v445_v14 = vld [vmem:[%s1233_s26 + $0x58] sm:$0xff]  ;;  %v444_v16 = vld [vmem:[%s1233_s26 + $0x50] sm:$0xff] }
  0x56   : > { %724 = vmatprep.subr.mxu0 %v345_v3  ;;  %757 = vmatprep.subr.mxu1 %v448_v8  ;;  %v339_v15 = vld [vmem:[%s1219_s16 + $0x38] sm:$0xff]  ;;  %v338_v17 = vld [vmem:[%s1219_s16 + $0x30] sm:$0xff]  ;;  %v443_v18 = vld [vmem:[%s1233_s26 + $0x48] sm:$0xff] }
  0x57   : > { %725 = vmatpush3.msra.mxu0 %v345_v3  ;;  %758 = vmatpush3.msra.mxu1 %v448_v8  ;;  %v337_v19 = vld [vmem:[%s1219_s16 + $0x28] sm:$0xff]  ;;  %v442_v20 = vld [vmem:[%s1233_s26 + $0x40] sm:$0xff]  ;;  %v441_v22 = vld [vmem:[%s1233_s26 + $0x38] sm:$0xff] }
  0x58   : > { %726 = vmatprep.subr.mxu0 %v344_v4  ;;  %759 = vmatprep.subr.mxu1 %v447_v10  ;;  %v336_v21 = vld [vmem:[%s1219_s16 + $0x20] sm:$0xff]  ;;  %v335_v23 = vld [vmem:[%s1219_s16 + $0x18] sm:$0xff]  ;;  %v440_v24 = vld [vmem:[%s1233_s26 + $0x30] sm:$0xff] }
  0x59   : > { %727 = vmatpush3.msra.mxu0 %v344_v4  ;;  %760 = vmatpush3.msra.mxu1 %v447_v10  ;;  %v334_v25 = vld [vmem:[%s1219_s16 + $0x10] sm:$0xff]  ;;  %v439_v26 = vld [vmem:[%s1233_s26 + $0x28] sm:$0xff]  ;;  %v438_v28 = vld [vmem:[%s1233_s26 + $0x20] sm:$0xff] }
  0x5a   : > { %728 = vmatprep.subr.mxu0 %v343_v6  ;;  %761 = vmatprep.subr.mxu1 %v446_v12  ;;  %v333_v27 = vld [vmem:[%s1219_s16 + $0x8] sm:$0xff]  ;;  %v332_v29 = vld [vmem:[%s1219_s16] sm:$0xff]  ;;  %v331_v30 = vld [vmem:[#allocation3 + $0x8] sm:$0xff] }
  0x5b   : > { %729 = vmatpush3.msra.mxu0 %v343_v6  ;;  %762 = vmatpush3.msra.mxu1 %v446_v12  ;;  %v437_v31 = vld [vmem:[%s1233_s26 + $0x18] sm:$0xff]  ;;  %v436_v32 = vld [vmem:[%s1233_s26 + $0x10] sm:$0xff]  ;;  %v435_v33 = vld [vmem:[%s1233_s26 + $0x8] sm:$0xff] }
  0x5c   : > { %730 = vmatprep.subr.mxu0 %v342_v9  ;;  %763 = vmatprep.subr.mxu1 %v445_v14  ;;  %v434_v34 = vld [vmem:[%s1233_s26] sm:$0xff]  ;;  %v433_v42 = vld [vmem:[#allocation2 + $0x8] sm:$0xff] }
  0x5d   : > { %731 = vmatpush3.msra.mxu0 %v342_v9  ;;  %764 = vmatpush3.msra.mxu1 %v445_v14  ;;  %v676_v35 = vld [vmem:[%s321_s25] ss:$0 sm:$0xff] }
  0x5e   : > { %732 = vmatprep.subr.mxu0 %v341_v11  ;;  %765 = vmatprep.subr.mxu1 %v444_v16  ;;  %v432_v44 = vld [vmem:[#allocation2] sm:$0xff] }
  0x5f   : > { %733 = vmatpush3.msra.mxu0 %v341_v11  ;;  %766 = vmatpush3.msra.mxu1 %v444_v16 }
  0x60   : > { %734 = vmatprep.subr.mxu0 %v340_v13  ;;  %767 = vmatprep.subr.mxu1 %v443_v18 }
  0x61   : > { %735 = vmatpush3.msra.mxu0 %v340_v13  ;;  %768 = vmatpush3.msra.mxu1 %v443_v18 }
  0x62   : > { %736 = vmatprep.subr.mxu0 %v339_v15  ;;  %769 = vmatprep.subr.mxu1 %v442_v20 }
  0x63   : > { %737 = vmatpush3.msra.mxu0 %v339_v15  ;;  %770 = vmatpush3.msra.mxu1 %v442_v20 }
  0x64   : > { %738 = vmatprep.subr.mxu0 %v338_v17  ;;  %771 = vmatprep.subr.mxu1 %v441_v22 }
  0x65   : > { %739 = vmatpush3.msra.mxu0 %v338_v17  ;;  %772 = vmatpush3.msra.mxu1 %v441_v22 }
  0x66   : > { %740 = vmatprep.subr.mxu0 %v337_v19  ;;  %773 = vmatprep.subr.mxu1 %v440_v24 }
  0x67   : > { %741 = vmatpush3.msra.mxu0 %v337_v19  ;;  %774 = vmatpush3.msra.mxu1 %v440_v24 }
  0x68   : > { %742 = vmatprep.subr.mxu0 %v336_v21  ;;  %775 = vmatprep.subr.mxu1 %v439_v26 }
  0x69   : > { %743 = vmatpush3.msra.mxu0 %v336_v21  ;;  %776 = vmatpush3.msra.mxu1 %v439_v26 }
  0x6a   : > { %744 = vmatprep.subr.mxu0 %v335_v23  ;;  %777 = vmatprep.subr.mxu1 %v438_v28 }
  0x6b   : > { %745 = vmatpush3.msra.mxu0 %v335_v23  ;;  %778 = vmatpush3.msra.mxu1 %v438_v28 }
  0x6c   : > { %746 = vmatprep.subr.mxu0 %v334_v25  ;;  %779 = vmatprep.subr.mxu1 %v437_v31 }
  0x6d   : > { %747 = vmatpush3.msra.mxu0 %v334_v25  ;;  %780 = vmatpush3.msra.mxu1 %v437_v31 }
  0x6e   : > { %748 = vmatprep.subr.mxu0 %v333_v27  ;;  %781 = vmatprep.subr.mxu1 %v436_v32 }
  0x6f   : > { %749 = vmatpush3.msra.mxu0 %v333_v27  ;;  %782 = vmatpush3.msra.mxu1 %v436_v32 }
  0x70   : > { %750 = vmatprep.subr.mxu0 %v332_v29  ;;  %783 = vmatprep.subr.mxu1 %v435_v33 }
  0x71   : > { %751 = vmatpush3.msra.mxu0 %v332_v29  ;;  %784 = vmatpush3.msra.mxu1 %v435_v33 }
  0x72   : > { %753 = vmatmul.mubr.f32.vlgmr.msra.gmra.mxu0 %v331_v30  ;;  %785 = vmatprep.subr.mxu1 %v434_v34 }
  0x73   : > { %786 = vmatpush3.msra.mxu1 %v434_v34 }
 0x132   : > { %v754_v36 = vpop.f32.mrf.mxu0 }
 0x133   : > { %v427_v37 = vadd.f32 %v754_v36, %v676_v35 }
 0x134   : > { %v421_v38 = vpop.f32.mrf.mxu0 }
 0x135   : > { %v422_v39 = vadd.f32 %v676_v35, %v421_v38  ;;  %v431_v41 = vmax.f32 %v427_v37, 0.0 }
 0x137   : > { %v430_v40 = vmax.f32 %v422_v39, 0.0 }
 0x139   : > { %787 = vmatprep.mubr.f32.mxu1 %v430_v40 }
 0x13a   : > { %788 = vmatmul.mubr.f32.vlgmr.msra.gmra.mxu1 %v431_v41 }
 0x1fa   : > { %v789_v43 = vpop.f32.mrf.mxu1 }
 0x1fb   : > { %v526_v45 = vadd.f32 %v789_v43, %v433_v42  ;;  %532 = sbr.rel (%p677_p5) target bundleno = 522 (0x20a), region = 60 }
 0x1fc   : > { %v516_v46 = vpop.f32.mrf.mxu1 }
 0x1fd   : > { %528 = vst [vmem:[#allocation2 + $0x8] sm:$0xff] %v526_v45  ;;  %v525_v47 = vadd.f32 %v516_v46, %v432_v44 }
 0x1ff   : > { %527 = vst [vmem:[#allocation2] sm:$0xff] %v525_v47 }
 0x200   : > { %v678_v49 = vld [vmem:[%s1311_s4] ss:$0 sm:$0xff] }
 0x204   : > { %v534_v50 = vld [vmem:[#allocation2 + $0x8] sm:$0xff] }
 0x205   : > { %v543_v52 = vadd.f32 %v678_v49, %v534_v50 }
 0x206   : > { %v533_v48 = vld [vmem:[#allocation2] sm:$0xff] }
 0x207   : > { %v542_v51 = vadd.f32 %v678_v49, %v533_v48  ;;  %545 = vst [vmem:[#allocation9 + $0x8] sm:$0xff] %v543_v52 }
 0x209   : > { %544 = vst [vmem:[#allocation9] sm:$0xff] %v542_v51 }
 0x20a PF: > { %p816_p8 = scmp.eq.s32.totalorder %s1155_s29, 1  ;;  %s1047_s11 = smov [#allocation9]  }
 0x20b   : > { %s555_s13 = sshll.u32 %s1047_s11, 4  ;;  %s556_s13 = int_to_ptr.vmem [resolvable:$true] %s555_s13 }
 0x20c   : > { %s956_s14 = scalar_lea.vmem %s556_s13, 256  ;;  %p963_p9 = scmp.lt.s32.totalorder %s556_s13, %s556_s13 }
 0x20d   : > { %p957_p10 = scmp.ne.s32.totalorder %s556_s13, %s956_s14  ;;  %p964_p11 = scmp.lt.s32.totalorder %s956_s14, %s956_s14 }
 0x20f   : > { %p958_p4 = pnand %p957_p10, %p816_p8  ;;  %p965_p12 = por %p964_p11, %p963_p9 }
 0x211   : > { %p959_p7 = pneg %p958_p4 }
 0x213   : > { %p966_p13 = pnand %p965_p12, %p959_p7 }
 0x215   : > { %969 = shalt.err (!%p966_p13)
}
 0x216   : > { %s1048_s21 = smov 128   ;;  %s1049_s27 = smov 8  }
 0x217   : > { %799 = dma.vmem_to_hbm [thread:$0]  (%p816_p8), %s556_s13, 256, %s1312_s5, [#allocation5], %s1048_s21, %s1048_s21, %s1049_s27  }
 0x218   : > { %1013 = dma.done.wait (%p816_p8), [#allocation5], 256  }
 0x219   : > { %1015 = vsyncadd (%p816_p8), [#allocation5], 4294967040 }
 0x21a PF: > { %s20_s23 = sadd.s32 1, %s1038_s23   ;;  %s1324_s18 = smov %s1022_s19 }
 0x21b   : > { %p17_p0 = scmp.ge.s32.totalorder %s20_s23, 4   ;;  %s1325_s19 = smov %s1026_s20 }
 0x21c   : > { %s1326_s20 = smov %s1127_s30  ;;  %s1327_s21 = smov %s1034_s22 }
 0x21d   : > { %s1328_s22 = smov %s1330_s24  ;;  %19 = sbr.rel (!%p17_p0) target bundleno = 6 (0x6), region = 106 }
 0x222   :  { %571 = vsyncpa [#allocation4], 1 }
 0x223   :  { %573 = vsyncpa [#allocation4 + $0x1], 1 }
 0x224   :  { %574 = vsyncpa [#allocation7], 1 }
 0x225   :  { %576 = vsyncpa [#allocation7 + $0x1], 1 }
 0x226   :  { %577 = vsyncpa [#allocation5], 1 }
 0x227   :  { %579 = vsyncpa [#allocation5 + $0x1], 1 }

</bundles_post_ra>
